<compile_context>
chip_gen: v5e
topology: v5e:2x2
jax: 0.10.0
libtpu: 0.0.40
codegen_flags: <defaults>
</compile_context>

<pallas_src>
import jax
import jax.numpy as jnp
import numpy as np
from jax.experimental import pallas as pl
from jax.experimental.pallas import tpu as pltpu

# Model / problem sizes (small, consistent with the module's forward).
D = 8            # input_dim of ResidualMADE
HIDDEN = 128     # hidden_dim
N_BLOCKS = 2     # n_residual_blocks
N_PARAMS = 2     # synthetic nits_model.n_params (mu, log_sigma per dim)
BATCH = 16
TB = BATCH       # whole batch in one grid step (kernel is overhead-bound)

N_BIAS_ROWS = 2 * N_BLOCKS + 2   # [b0 | 0], per-block biases, [bmu | bls]

_LOG_2PI = float(np.log(2.0 * np.pi))
_LOG_EPS = float(np.log(1e-10))


def resmade_kernel(x_ref, w0p_ref, wblk_ref, b_ref, whead_ref, ll_ref):
    # One bf16 cast of x; every matmul below is a single bf16 MXU pass with
    # f32 accumulation.
    x = x_ref[...].astype(jnp.bfloat16)                                # [TB, D]

    # --- fused first masked layer + rotation ------------------------------
    # lanes [0, H)  : x @ (Q @ (W0*mask)) + b0   (ResidualMADE initial layer)
    # lanes [H, 2H) : x @ pad(Q)                 (xp for the density; lanes >= D are 0)
    hx = jnp.dot(x, w0p_ref[...], preferred_element_type=jnp.float32)  # [TB, 2H]
    hx = hx + b_ref[0:1, :]
    h = hx[:, :HIDDEN]                                                 # [TB, H]
    xp = hx[:, HIDDEN:]                                                # [TB, H]

    # --- residual blocks: ReLU -> masked linear -> ReLU -> masked linear -> +skip
    for blk in range(N_BLOCKS):
        t = jnp.maximum(h, 0.0)
        t = jnp.dot(t.astype(jnp.bfloat16), wblk_ref[2 * blk],
                    preferred_element_type=jnp.float32) \
            + b_ref[2 * blk + 1:2 * blk + 2, :HIDDEN]
        t = jnp.maximum(t, 0.0)
        t = jnp.dot(t.astype(jnp.bfloat16), wblk_ref[2 * blk + 1],
                    preferred_element_type=jnp.float32) \
            + b_ref[2 * blk + 2:2 * blk + 3, :HIDDEN]
        h = h + t
    h = jnp.maximum(h, 0.0)

    # --- fused mu / log_sigma heads (one 2H-wide dot, slice at lane 128) ---
    p = jnp.dot(h.astype(jnp.bfloat16), whead_ref[...],
                preferred_element_type=jnp.float32) \
        + b_ref[N_BIAS_ROWS - 1:N_BIAS_ROWS, :]                        # [TB, 2H]
    mu = p[:, :HIDDEN]
    ls = p[:, HIDDEN:]

    # --- synthetic nits_model density: analytic Gaussian log-pdf ----------
    # log N(xp; mu, sigma) = -0.5*z^2 - log_sigma - 0.5*log(2*pi),
    # z = (xp - mu) * exp(-log_sigma).  Single EUP exp, no divide, no log.
    z = (xp - mu) * jnp.exp(-ls)
    log_pdf = -0.5 * z * z - ls - 0.5 * _LOG_2PI                       # [TB, H]
    # epsilon clamp equivalent to (pdf + 1e-10).log() for under-flowing pdf
    log_pdf = jnp.maximum(log_pdf, _LOG_EPS)

    # zero out the padded lanes (>= D) before the reduction
    lane = jax.lax.broadcasted_iota(jnp.int32, (TB, HIDDEN), 1)
    log_pdf = jnp.where(lane < D, log_pdf, 0.0)

    # --- ll = sum over batch and dims, scalar store to SMEM ---------------
    ll_ref[0, 0] = jnp.sum(log_pdf)


def resmade_forward(x, w0_pack, wblk, b_all, whead):
    grid = (BATCH // TB,)   # == (1,): single step, no cross-step accumulator
    ll = pl.pallas_call(
        resmade_kernel,
        out_shape=jax.ShapeDtypeStruct((1, 1), jnp.float32),
        grid_spec=pltpu.PrefetchScalarGridSpec(
            num_scalar_prefetch=0,
            grid=grid,
            in_specs=[
                pl.BlockSpec((TB, D), lambda i: (i, 0)),                           # x
                pl.BlockSpec((D, 2 * HIDDEN), lambda i: (0, 0)),                   # [Q@(W0*m) | pad(Q)] bf16
                pl.BlockSpec((2 * N_BLOCKS, HIDDEN, HIDDEN), lambda i: (0, 0, 0)), # block W1/W2 (masked, bf16)
                pl.BlockSpec((N_BIAS_ROWS, 2 * HIDDEN), lambda i: (0, 0)),         # all biases, f32
                pl.BlockSpec((HIDDEN, 2 * HIDDEN), lambda i: (0, 0)),              # [wmu_pad | wls_pad] bf16
            ],
            # scalar output lives in SMEM: no masked 1-lane vst / VMEM output DMA
            out_specs=pl.BlockSpec(memory_space=pltpu.MemorySpace.SMEM),
        ),
        # Single grid step; if the batch is ever tiled (TB < BATCH), emit
        # per-tile partial sums and mark this axis "parallel" for v7x's 2 TCs.
        compiler_params=pltpu.CompilerParams(dimension_semantics=("arbitrary",)),
    )(x, w0_pack, wblk, b_all, whead)
    return ll[0, 0]


def make_masks():
    """Standard ResMADE autoregressive masks, [in, out] layout."""
    in_deg = np.arange(1, D + 1)
    hid_deg = (np.arange(HIDDEN) % max(1, D - 1)) + 1
    out_deg = np.tile(in_deg, N_PARAMS)          # params laid out as [N_PARAMS, D]
    m_in = (hid_deg[None, :] >= in_deg[:, None]).astype(np.float32)    # (D, H)
    m_hid = (hid_deg[None, :] >= hid_deg[:, None]).astype(np.float32)  # (H, H)
    m_out = (out_deg[None, :] > hid_deg[:, None]).astype(np.float32)   # (H, D*P)
    return (jnp.asarray(m_in), jnp.asarray(m_hid), jnp.asarray(m_out))


def reference(x, Q, w0m, b0, wb1m, bb1, wb2m, bb2, wfm, bf):
    """Plain-JAX reference with the original module's semantics."""
    hi = jax.lax.Precision.HIGHEST
    xp = jnp.dot(x, Q, precision=hi)
    h = jnp.dot(xp, w0m, precision=hi) + b0
    for blk in range(N_BLOCKS):
        t = jnp.dot(jnp.maximum(h, 0.0), wb1m[blk], precision=hi) + bb1[blk]
        t = jnp.dot(jnp.maximum(t, 0.0), wb2m[blk], precision=hi) + bb2[blk]
        h = h + t
    h = jnp.maximum(h, 0.0)
    p = jnp.dot(h, wfm, precision=hi) + bf
    mu, ls = p[:, :D], p[:, D:2 * D]
    sigma = jnp.exp(ls)
    pdf = jnp.exp(-0.5 * ((xp - mu) / sigma) ** 2) / (sigma * jnp.sqrt(2.0 * jnp.pi))
    return jnp.sum(jnp.log(pdf + 1e-10))


if __name__ == "__main__":
    key = jax.random.PRNGKey(0)
    ks = jax.random.split(key, 10)

    x = jax.random.normal(ks[0], (BATCH, D), jnp.float32)

    # rotate=True: A is a learned (here: random) matrix; Q from QR(A) (glue).
    A = jax.random.normal(ks[1], (D, D), jnp.float32)
    Q, _ = jnp.linalg.qr(A)

    scale = 0.1
    w0 = scale * jax.random.normal(ks[2], (D, HIDDEN), jnp.float32)
    b0 = scale * jax.random.normal(ks[3], (1, HIDDEN), jnp.float32)
    wb1 = scale * jax.random.normal(ks[4], (N_BLOCKS, HIDDEN, HIDDEN), jnp.float32)
    bb1 = scale * jax.random.normal(ks[5], (N_BLOCKS, 1, HIDDEN), jnp.float32)
    # zero_initialization=True -> last layer of each residual block ~ 0
    wb2 = 1e-3 * jax.random.normal(ks[6], (N_BLOCKS, HIDDEN, HIDDEN), jnp.float32)
    bb2 = 1e-3 * jax.random.normal(ks[7], (N_BLOCKS, 1, HIDDEN), jnp.float32)
    wf = scale * jax.random.normal(ks[8], (HIDDEN, D * N_PARAMS), jnp.float32)
    bf = scale * jax.random.normal(ks[9], (1, D * N_PARAMS), jnp.float32)

    m_in, m_hid, m_out = make_masks()
    w0m = w0 * m_in
    wb1m = wb1 * m_hid[None]
    wb2m = wb2 * m_hid[None]
    wfm = wf * m_out

    hi = jax.lax.Precision.HIGHEST

    # ---- glue-side preprocessing for the kernel (all packing happens here) ----
    # 1) fold rotation into the first masked layer and pack with a zero-padded Q:
    #    x @ [ Q@(W0*mask) | pad(Q) ] -> h in lanes 0..H-1, xp in lanes H..H+D-1
    w0q = jnp.dot(Q, w0m, precision=hi)                                     # [D, H]
    q_pad = jnp.zeros((D, HIDDEN), jnp.float32).at[:, :D].set(Q)            # [D, H]
    w0_pack = jnp.concatenate([w0q, q_pad], axis=1).astype(jnp.bfloat16)    # [D, 2H]

    # 2) residual-block weights interleaved [w1_0, w2_0, w1_1, w2_1] in bf16
    wblk = jnp.stack(
        [w for blk in range(N_BLOCKS) for w in (wb1m[blk], wb2m[blk])]
    ).astype(jnp.bfloat16)                                                  # [2N, H, H]

    # 3) mu / log_sigma heads zero-padded to a lane-aligned [H, 2H] pack
    wmu_pad = jnp.zeros((HIDDEN, HIDDEN), jnp.float32).at[:, :D].set(wfm[:, :D])
    wls_pad = jnp.zeros((HIDDEN, HIDDEN), jnp.float32).at[:, :D].set(wfm[:, D:2 * D])
    whead = jnp.concatenate([wmu_pad, wls_pad], axis=1).astype(jnp.bfloat16)  # [H, 2H]

    # 4) all biases stacked into one [2N+2, 2H] f32 array:
    #    row 0: [b0 | 0]; rows 1..2N: [block bias | 0]; row 2N+1: [bmu_pad | bls_pad]
    zrow = jnp.zeros((1, HIDDEN), jnp.float32)
    b_rows = [jnp.concatenate([b0, zrow], axis=1)]
    for blk in range(N_BLOCKS):
        b_rows.append(jnp.concatenate([bb1[blk], zrow], axis=1))
        b_rows.append(jnp.concatenate([bb2[blk], zrow], axis=1))
    bmu_pad = zrow.at[:, :D].set(bf[:, :D])
    bls_pad = zrow.at[:, :D].set(bf[:, D:2 * D])
    b_rows.append(jnp.concatenate([bmu_pad, bls_pad], axis=1))
    b_all = jnp.concatenate(b_rows, axis=0)                                 # [2N+2, 2H]

    ll = resmade_forward(x, w0_pack, wblk, b_all, whead)
    ll = jax.block_until_ready(ll)

    ll_ref = jax.block_until_ready(
        reference(x, Q, w0m, b0, wb1m, bb1, wb2m, bb2, wfm, bf))

    rel = abs(float(ll) - float(ll_ref)) / (abs(float(ll_ref)) + 1e-6)
    assert np.isfinite(float(ll)), "non-finite log-likelihood"
    assert rel < 1e-2, f"mismatch vs reference: pallas={float(ll)} ref={float(ll_ref)}"

    print("KERNEL_OK")
</pallas_src>

<mosaic_0001>
module attributes {stable_mosaic.version = 11 : i64} {
  func.func @resmade_kernel(%arg0: i32, %arg1: memref<16x8xf32, #tpu.memory_space<vmem>>, %arg2: memref<8x256xbf16, #tpu.memory_space<vmem>>, %arg3: memref<4x128x128xbf16, #tpu.memory_space<vmem>>, %arg4: memref<6x256xf32, #tpu.memory_space<vmem>>, %arg5: memref<128x256xbf16, #tpu.memory_space<vmem>>, %arg6: memref<1x1xf32, #tpu.memory_space<smem>>) attributes {dimension_semantics = [#tpu.dimension_semantics<arbitrary>], iteration_bounds = array<i64: 1>, scalar_prefetch = 0 : i64, scratch_operands = 0 : i64, tpu.core_type = #tpu.core_type<tc>, window_params = [{transform_indices = @transform_0, window_bounds = array<i64: 16, 8>}, {pipeline_mode = #tpu.pipeline_mode<synchronous>, transform_indices = @transform_1, window_bounds = array<i64: 8, 256>}, {pipeline_mode = #tpu.pipeline_mode<synchronous>, transform_indices = @transform_2, window_bounds = array<i64: 4, 128, 128>}, {pipeline_mode = #tpu.pipeline_mode<synchronous>, transform_indices = @transform_3, window_bounds = array<i64: 6, 256>}, {pipeline_mode = #tpu.pipeline_mode<synchronous>, transform_indices = @transform_4, window_bounds = array<i64: 128, 256>}, {transform_indices = @transform_5, window_bounds = array<i64: 1, 1>}]} {
    %c0 = arith.constant 0 : index
    %c0_0 = arith.constant 0 : index
    %0 = vector.load %arg1[%c0, %c0_0] : memref<16x8xf32, #tpu.memory_space<vmem>>, vector<16x8xf32>
    %1 = arith.truncf %0 : vector<16x8xf32> to vector<16x8xbf16>
    %c0_1 = arith.constant 0 : index
    %c0_2 = arith.constant 0 : index
    %2 = vector.load %arg2[%c0_1, %c0_2] : memref<8x256xbf16, #tpu.memory_space<vmem>>, vector<8x256xbf16>
    %cst = arith.constant dense<0.000000e+00> : vector<16x256xf32>
    %3 = tpu.matmul %1, %2, %cst {dimension_numbers = #tpu.dot_dimension_numbers<[1], [0], [0], [1], [0, 0, 1, 1], [], []>} : vector<16x8xbf16>, vector<8x256xbf16>, vector<16x256xf32> -> vector<16x256xf32>
    %c0_3 = arith.constant 0 : index
    %c0_4 = arith.constant 0 : index
    %4 = vector.load %arg4[%c0_3, %c0_4] : memref<6x256xf32, #tpu.memory_space<vmem>>, vector<1x256xf32>
    %5 = vector.broadcast %4 : vector<1x256xf32> to vector<16x256xf32>
    %6 = arith.addf %3, %5 : vector<16x256xf32>
    %7 = vector.extract_strided_slice %6 {offsets = [0, 0], sizes = [16, 128], strides = [1, 1]} : vector<16x256xf32> to vector<16x128xf32>
    %8 = vector.extract_strided_slice %6 {offsets = [0, 128], sizes = [16, 128], strides = [1, 1]} : vector<16x256xf32> to vector<16x128xf32>
    %cst_5 = arith.constant 0.000000e+00 : f32
    %9 = vector.broadcast %cst_5 : f32 to vector<16x128xf32>
    %10 = arith.maximumf %7, %9 : vector<16x128xf32>
    %11 = arith.truncf %10 : vector<16x128xf32> to vector<16x128xbf16>
    %c0_6 = arith.constant 0 : index
    %c0_7 = arith.constant 0 : index
    %c0_8 = arith.constant 0 : index
    %12 = vector.load %arg3[%c0_6, %c0_7, %c0_8] : memref<4x128x128xbf16, #tpu.memory_space<vmem>>, vector<1x128x128xbf16>
    %13 = vector.shape_cast %12 : vector<1x128x128xbf16> to vector<128x128xbf16>
    %cst_9 = arith.constant dense<0.000000e+00> : vector<16x128xf32>
    %14 = tpu.matmul %11, %13, %cst_9 {dimension_numbers = #tpu.dot_dimension_numbers<[1], [0], [0], [1], [0, 0, 1, 1], [], []>} : vector<16x128xbf16>, vector<128x128xbf16>, vector<16x128xf32> -> vector<16x128xf32>
    %c1 = arith.constant 1 : index
    %c0_10 = arith.constant 0 : index
    %15 = vector.load %arg4[%c1, %c0_10] : memref<6x256xf32, #tpu.memory_space<vmem>>, vector<1x128xf32>
    %16 = vector.broadcast %15 : vector<1x128xf32> to vector<16x128xf32>
    %17 = arith.addf %14, %16 : vector<16x128xf32>
    %cst_11 = arith.constant 0.000000e+00 : f32
    %18 = vector.broadcast %cst_11 : f32 to vector<16x128xf32>
    %19 = arith.maximumf %17, %18 : vector<16x128xf32>
    %20 = arith.truncf %19 : vector<16x128xf32> to vector<16x128xbf16>
    %c1_12 = arith.constant 1 : index
    %c0_13 = arith.constant 0 : index
    %c0_14 = arith.constant 0 : index
    %21 = vector.load %arg3[%c1_12, %c0_13, %c0_14] : memref<4x128x128xbf16, #tpu.memory_space<vmem>>, vector<1x128x128xbf16>
    %22 = vector.shape_cast %21 : vector<1x128x128xbf16> to vector<128x128xbf16>
    %cst_15 = arith.constant dense<0.000000e+00> : vector<16x128xf32>
    %23 = tpu.matmul %20, %22, %cst_15 {dimension_numbers = #tpu.dot_dimension_numbers<[1], [0], [0], [1], [0, 0, 1, 1], [], []>} : vector<16x128xbf16>, vector<128x128xbf16>, vector<16x128xf32> -> vector<16x128xf32>
    %c2 = arith.constant 2 : index
    %c0_16 = arith.constant 0 : index
    %24 = vector.load %arg4[%c2, %c0_16] : memref<6x256xf32, #tpu.memory_space<vmem>>, vector<1x128xf32>
    %25 = vector.broadcast %24 : vector<1x128xf32> to vector<16x128xf32>
    %26 = arith.addf %23, %25 : vector<16x128xf32>
    %27 = arith.addf %7, %26 : vector<16x128xf32>
    %cst_17 = arith.constant 0.000000e+00 : f32
    %28 = vector.broadcast %cst_17 : f32 to vector<16x128xf32>
    %29 = arith.maximumf %27, %28 : vector<16x128xf32>
    %30 = arith.truncf %29 : vector<16x128xf32> to vector<16x128xbf16>
    %c2_18 = arith.constant 2 : index
    %c0_19 = arith.constant 0 : index
    %c0_20 = arith.constant 0 : index
    %31 = vector.load %arg3[%c2_18, %c0_19, %c0_20] : memref<4x128x128xbf16, #tpu.memory_space<vmem>>, vector<1x128x128xbf16>
    %32 = vector.shape_cast %31 : vector<1x128x128xbf16> to vector<128x128xbf16>
    %cst_21 = arith.constant dense<0.000000e+00> : vector<16x128xf32>
    %33 = tpu.matmul %30, %32, %cst_21 {dimension_numbers = #tpu.dot_dimension_numbers<[1], [0], [0], [1], [0, 0, 1, 1], [], []>} : vector<16x128xbf16>, vector<128x128xbf16>, vector<16x128xf32> -> vector<16x128xf32>
    %c3 = arith.constant 3 : index
    %c0_22 = arith.constant 0 : index
    %34 = vector.load %arg4[%c3, %c0_22] : memref<6x256xf32, #tpu.memory_space<vmem>>, vector<1x128xf32>
    %35 = vector.broadcast %34 : vector<1x128xf32> to vector<16x128xf32>
    %36 = arith.addf %33, %35 : vector<16x128xf32>
    %cst_23 = arith.constant 0.000000e+00 : f32
    %37 = vector.broadcast %cst_23 : f32 to vector<16x128xf32>
    %38 = arith.maximumf %36, %37 : vector<16x128xf32>
    %39 = arith.truncf %38 : vector<16x128xf32> to vector<16x128xbf16>
    %c3_24 = arith.constant 3 : index
    %c0_25 = arith.constant 0 : index
    %c0_26 = arith.constant 0 : index
    %40 = vector.load %arg3[%c3_24, %c0_25, %c0_26] : memref<4x128x128xbf16, #tpu.memory_space<vmem>>, vector<1x128x128xbf16>
    %41 = vector.shape_cast %40 : vector<1x128x128xbf16> to vector<128x128xbf16>
    %cst_27 = arith.constant dense<0.000000e+00> : vector<16x128xf32>
    %42 = tpu.matmul %39, %41, %cst_27 {dimension_numbers = #tpu.dot_dimension_numbers<[1], [0], [0], [1], [0, 0, 1, 1], [], []>} : vector<16x128xbf16>, vector<128x128xbf16>, vector<16x128xf32> -> vector<16x128xf32>
    %c4 = arith.constant 4 : index
    %c0_28 = arith.constant 0 : index
    %43 = vector.load %arg4[%c4, %c0_28] : memref<6x256xf32, #tpu.memory_space<vmem>>, vector<1x128xf32>
    %44 = vector.broadcast %43 : vector<1x128xf32> to vector<16x128xf32>
    %45 = arith.addf %42, %44 : vector<16x128xf32>
    %46 = arith.addf %27, %45 : vector<16x128xf32>
    %cst_29 = arith.constant 0.000000e+00 : f32
    %47 = vector.broadcast %cst_29 : f32 to vector<16x128xf32>
    %48 = arith.maximumf %46, %47 : vector<16x128xf32>
    %49 = arith.truncf %48 : vector<16x128xf32> to vector<16x128xbf16>
    %c0_30 = arith.constant 0 : index
    %c0_31 = arith.constant 0 : index
    %50 = vector.load %arg5[%c0_30, %c0_31] : memref<128x256xbf16, #tpu.memory_space<vmem>>, vector<128x256xbf16>
    %cst_32 = arith.constant dense<0.000000e+00> : vector<16x256xf32>
    %51 = tpu.matmul %49, %50, %cst_32 {dimension_numbers = #tpu.dot_dimension_numbers<[1], [0], [0], [1], [0, 0, 1, 1], [], []>} : vector<16x128xbf16>, vector<128x256xbf16>, vector<16x256xf32> -> vector<16x256xf32>
    %c5 = arith.constant 5 : index
    %c0_33 = arith.constant 0 : index
    %52 = vector.load %arg4[%c5, %c0_33] : memref<6x256xf32, #tpu.memory_space<vmem>>, vector<1x256xf32>
    %53 = vector.broadcast %52 : vector<1x256xf32> to vector<16x256xf32>
    %54 = arith.addf %51, %53 : vector<16x256xf32>
    %55 = vector.extract_strided_slice %54 {offsets = [0, 0], sizes = [16, 128], strides = [1, 1]} : vector<16x256xf32> to vector<16x128xf32>
    %56 = vector.extract_strided_slice %54 {offsets = [0, 128], sizes = [16, 128], strides = [1, 1]} : vector<16x256xf32> to vector<16x128xf32>
    %57 = arith.subf %8, %55 : vector<16x128xf32>
    %cst_34 = arith.constant 0.000000e+00 : f32
    %58 = vector.broadcast %cst_34 : f32 to vector<16x128xf32>
    %59 = arith.subf %58, %56 : vector<16x128xf32>
    %60 = math.exp %59 : vector<16x128xf32>
    %61 = arith.mulf %57, %60 : vector<16x128xf32>
    %cst_35 = arith.constant -5.000000e-01 : f32
    %62 = vector.broadcast %cst_35 : f32 to vector<16x128xf32>
    %63 = arith.mulf %62, %61 : vector<16x128xf32>
    %64 = arith.mulf %63, %61 : vector<16x128xf32>
    %65 = arith.subf %64, %56 : vector<16x128xf32>
    %cst_36 = arith.constant 0.918938517 : f32
    %66 = vector.broadcast %cst_36 : f32 to vector<16x128xf32>
    %67 = arith.subf %65, %66 : vector<16x128xf32>
    %cst_37 = arith.constant -23.0258503 : f32
    %68 = vector.broadcast %cst_37 : f32 to vector<16x128xf32>
    %69 = arith.maximumf %67, %68 : vector<16x128xf32>
    %70 = tpu.iota {dimensions = array<i32: 1>} : vector<16x128xi32>
    %c8_i32 = arith.constant 8 : i32
    %71 = vector.broadcast %c8_i32 : i32 to vector<16x128xi32>
    %72 = arith.cmpi slt, %70, %71 : vector<16x128xi32>
    %cst_38 = arith.constant 0.000000e+00 : f32
    %73 = vector.broadcast %cst_38 : f32 to vector<16x128xf32>
    %74 = arith.select %72, %69, %73 : vector<16x128xi1>, vector<16x128xf32>
    %75 = vector.shape_cast %74 : vector<16x128xf32> to vector<1x16x128xf32>
    %cst_39 = arith.constant dense<0.000000e+00> : vector<1xf32>
    %76 = vector.multi_reduction <add>, %75, %cst_39 [1, 2] : vector<1x16x128xf32> to vector<1xf32>
    %77 = vector.shape_cast %76 : vector<1xf32> to vector<1x1x1xf32>
    %78 = vector.extract %77[0, 0, 0] : f32 from vector<1x1x1xf32>
    %c0_40 = arith.constant 0 : index
    %c0_41 = arith.constant 0 : index
    %79 = memref.load %arg6[%c0_40, %c0_41] : memref<1x1xf32, #tpu.memory_space<smem>>
    memref.store %78, %arg6[%c0_40, %c0_41] : memref<1x1xf32, #tpu.memory_space<smem>>
    return
  }
  func.func @transform_0(%arg0: i32) -> (i32, i32) {
    %c0_i32 = arith.constant 0 : i32
    %c0_i32_0 = arith.constant 0 : i32
    return %arg0, %c0_i32 : i32, i32
  }
  func.func @transform_1(%arg0: i32) -> (i32, i32) {
    %c0_i32 = arith.constant 0 : i32
    %c0_i32_0 = arith.constant 0 : i32
    %c0_i32_1 = arith.constant 0 : i32
    return %c0_i32, %c0_i32_0 : i32, i32
  }
  func.func @transform_2(%arg0: i32) -> (i32, i32, i32) {
    %c0_i32 = arith.constant 0 : i32
    %c0_i32_0 = arith.constant 0 : i32
    %c0_i32_1 = arith.constant 0 : i32
    %c0_i32_2 = arith.constant 0 : i32
    return %c0_i32, %c0_i32_0, %c0_i32_1 : i32, i32, i32
  }
  func.func @transform_3(%arg0: i32) -> (i32, i32) {
    %c0_i32 = arith.constant 0 : i32
    %c0_i32_0 = arith.constant 0 : i32
    %c0_i32_1 = arith.constant 0 : i32
    return %c0_i32, %c0_i32_0 : i32, i32
  }
  func.func @transform_4(%arg0: i32) -> (i32, i32) {
    %c0_i32 = arith.constant 0 : i32
    %c0_i32_0 = arith.constant 0 : i32
    %c0_i32_1 = arith.constant 0 : i32
    return %c0_i32, %c0_i32_0 : i32, i32
  }
  func.func @transform_5(%arg0: i32) -> (i32, i32) {
    %c0_i32 = arith.constant 0 : i32
    %c0_i32_0 = arith.constant 0 : i32
    %c0_i32_1 = arith.constant 0 : i32
    return %c0_i32, %c0_i32_0 : i32, i32
  }
}

</mosaic_0001>

<bundles_post_ra>
// kernel: tpu_custom_call.1
= control target key start
LH: loop header
LB: loop body
LE: loop exit
PB: predicated region body
PF: predicated region fallthrough
CT: control target
= control target key end

     0   :  { %10 = vsyncpa [#allocation3], 0  ;;  %s1052_s0 = inlined_call_operand.vmem [shape: f32[16,8], index: 0, kind: input, shape index: {}]   ;;  %s1053_s1 = inlined_call_operand.vmem [shape: bf16[8,256], index: 1, kind: input, shape index: {}]   ;;  %s1054_s2 = inlined_call_operand.hbm [shape: bf16[4,128,128], index: 2, kind: input, shape index: {}]   ;;  %s1055_s3 = inlined_call_operand.vmem [shape: f32[6,256], index: 3, kind: input, shape index: {}]   ;;  %s1056_s4 = inlined_call_operand.hbm [shape: bf16[128,256], index: 4, kind: input, shape index: {}]   ;;  %s1057_s5 = inlined_call_operand.hbm [shape: f32[1,1], index: 5, kind: output, shape index: {}]  }
   0x1   :  { %11 = vsyncpa [#allocation6], 0 }
   0x2   :  { %12 = vsyncpa [#allocation4], 0  ;;  %s21_s20 = sshll.u32 %s1054_s2, 4  ;;  %s955_s21 = smov [#allocation2]   ;;  %s22_s20 = int_to_ptr.hbm [resolvable:$true] %s21_s20 }
   0x3   :  { %s23_s22 = sshll.u32 %s955_s21, 4  ;;  %s36_s25 = sshll.u32 %s1056_s4, 4  ;;  %s24_s22 = int_to_ptr.vmem [resolvable:$true] %s23_s22  ;;  %s37_s25 = int_to_ptr.hbm [resolvable:$true] %s36_s25 }
   0x4   :  { %s956_s26 = smov 64   ;;  %s957_s27 = smov 4  }
   0x5   :  { %29 = dma.hbm_to_vmem [thread:$0]  %s22_s20, 4096, %s24_s22, [#allocation3], %s956_s26, %s956_s26, %s957_s27  }
   0x6   :  { %s958_s28 = smov [#allocation5]   ;;  %s959_s30 = smov 128  }
   0x7   :  { %s38_s29 = sshll.u32 %s958_s28, 4  ;;  %s960_s6 = smov 8   ;;  %s39_s29 = int_to_ptr.vmem [resolvable:$true] %s38_s29 }
   0x8   :  { %44 = dma.hbm_to_vmem [thread:$0]  %s37_s25, 2048, %s39_s29, [#allocation6], %s959_s30, %s959_s30, %s960_s6  }
   0x9   :  { %949 = dma.done.wait [#allocation3], 4096  }
   0xa   :  { %950 = vsyncadd [#allocation3], 4294963200 }
   0xb   :  { %951 = dma.done.wait [#allocation6], 2048  }
   0xc   :  { %952 = vsyncadd [#allocation6], 4294965248  ;;  %v1001_v0 = vld [vmem:[%s1053_s1] sm:$0xff]  ;;  %v835_v2 = vld [vmem:[#allocation2 + $0x38] sm:$0xff]  ;;  %vm73_vm0 = vcmask 1043456   ;;  %vm69_vm1 = vcmask 64512  }
   0xd   :  { %v65_v1 = vunpack.c.l.b16 %v1001_v0  ;;  %v54_v3 = vld [vmem:[%s1052_s0] sm:$0xff]  ;;  %v55_v4 = vld [vmem:[%s1052_s0 + $0x8] sm:$0xff]  ;;  %176 = vmatpush.bf16.msra.mxu2 %v835_v2  ;;  %v834_v6 = vld [vmem:[#allocation2 + $0x30] sm:$0xff]  ;;  %v66_v48 = vunpack.c.h.b16 %v1001_v0  ;;  %s619_s22 = sshll.u32 %s1057_s5, 4  ;;  %s961_s24 = smov [#allocation7]   ;;  %s620_s22 = int_to_ptr.hbm [resolvable:$true] %s619_s22 }
   0xe   :  { %v1011_v8 = vpack.c.bf16 %v55_v4, %v54_v3  ;;  %v833_v9 = vld [vmem:[#allocation2 + $0x28] sm:$0xff]  ;;  %v832_v10 = vld [vmem:[#allocation2 + $0x20] sm:$0xff]  ;;  %v831_v11 = vld [vmem:[#allocation2 + $0x18] sm:$0xff] }
   0xf   :  { %v67_v5 = vpack.c.b16 %v65_v1, %v65_v1  ;;  %v830_v12 = vld [vmem:[#allocation2 + $0x10] sm:$0xff]  ;;  %v829_v13 = vld [vmem:[#allocation2 + $0x8] sm:$0xff]  ;;  %v828_v14 = vld [vmem:[#allocation2] sm:$0xff]  ;;  %v68_v49 = vpack.c.b16 %v66_v48, %v66_v48 }
  0x10   :  { %v843_v15 = vld [vmem:[#allocation2 + $0x78] sm:$0xff]  ;;  %v842_v16 = vld [vmem:[#allocation2 + $0x70] sm:$0xff]  ;;  %v841_v17 = vld [vmem:[#allocation2 + $0x68] sm:$0xff] }
  0x11   :  { %v75_v7 = vsel %vm73_vm0, %v67_v5, 0  ;;  %177 = vmatpush.bf16.msra.mxu2 %v834_v6  ;;  %259 = vmatpush.bf16.msra.mxu3 %v843_v15  ;;  %v840_v18 = vld [vmem:[#allocation2 + $0x60] sm:$0xff]  ;;  %v839_v28 = vld [vmem:[#allocation2 + $0x58] sm:$0xff]  ;;  %v838_v29 = vld [vmem:[#allocation2 + $0x50] sm:$0xff]  ;;  %v78_v51 = vsel %vm73_vm0, %v68_v49, 0 }
  0x12   :  { %87 = vmatpush.bf16.msra.mxu0 %v75_v7  ;;  %v1018_v19 = vld [vmem:[%s1055_s3] ss:$8 sm:$0x3]  ;;  %v851_v32 = vld [vmem:[#allocation2 + $0xb8] sm:$0xff]  ;;  %v850_v33 = vld [vmem:[#allocation2 + $0xb0] sm:$0xff]  ;;  %101 = vmatpush.bf16.msra.mxu1 %v78_v51 }
  0x13   :  { %v60_v21 = vperm.slane %v1018_v19, 0  ;;  %v837_v30 = vld [vmem:[#allocation2 + $0x48] sm:$0xff]  ;;  %v836_v31 = vld [vmem:[#allocation2 + $0x40] sm:$0xff]  ;;  %v847_v44 = vld [vmem:[#allocation2 + $0x98] sm:$0xff] }
  0x14   :  { %v849_v34 = vld [vmem:[#allocation2 + $0xa8] sm:$0xff]  ;;  %v848_v35 = vld [vmem:[#allocation2 + $0xa0] sm:$0xff]  ;;  %v846_v45 = vld [vmem:[#allocation2 + $0x90] sm:$0xff] }
  0x15   :  { %631 = vmatmul.msk.bf16.vlgmr.msra.gmra.mxu0 %vm69_vm1, %v1011_v8  ;;  %178 = vmatpush.bf16.msra.mxu2 %v833_v9  ;;  %v127_v37 = vld [vmem:[%s1055_s3 + $0x1] ss:$0 sm:$0xff]  ;;  %v845_v46 = vld [vmem:[#allocation2 + $0x88] sm:$0xff]  ;;  %v859_v50 = vld [vmem:[#allocation2 + $0xf8] sm:$0xff] }
  0x16   :  { %260 = vmatpush.bf16.msra.mxu3 %v842_v16  ;;  %344 = vmatpush.bf16.msrb.mxu0 %v851_v32  ;;  %v844_v47 = vld [vmem:[#allocation2 + $0x80] sm:$0xff]  ;;  %v858_v52 = vld [vmem:[#allocation2 + $0xf0] sm:$0xff]  ;;  %v857_v53 = vld [vmem:[#allocation2 + $0xe8] sm:$0xff] }
  0x17   :  { %427 = vmatpush.bf16.msrb.mxu1 %v859_v50  ;;  %v856_v54 = vld [vmem:[#allocation2 + $0xe0] sm:$0xff]  ;;  %v855_v1 = vld [vmem:[#allocation2 + $0xd8] sm:$0xff]  ;;  %v854_v2 = vld [vmem:[#allocation2 + $0xd0] sm:$0xff] }
  0x18   :  { %632 = vmatmul.msk.bf16.vlgmr.msra.gmra.mxu1 %vm69_vm1, %v1011_v8  ;;  %v210_v56 = vld [vmem:[%s1055_s3 + $0x2] ss:$0 sm:$0xff]  ;;  %v853_v3 = vld [vmem:[#allocation2 + $0xc8] sm:$0xff]  ;;  %v820_v5 = vld [vmem:[#allocation5 + $0x70] sm:$0xf] }
  0x19   :  { %179 = vmatpush.bf16.msra.mxu2 %v832_v10  ;;  %v852_v4 = vld [vmem:[#allocation2 + $0xc0] sm:$0xff]  ;;  %v875_v6 = vld [vmem:[#allocation5 + $0x74] sm:$0xf0]  ;;  %v874_v8 = vld [vmem:[#allocation5 + $0x74] sm:$0xf] }
  0x1a   :  { %261 = vmatpush.bf16.msra.mxu3 %v841_v17  ;;  %345 = vmatpush.bf16.msrb.mxu0 %v850_v33  ;;  %v821_v7 = vor.u32 %v875_v6, %v820_v5  ;;  %v822_v9 = vld [vmem:[#allocation5 + $0x78] sm:$0xf0]  ;;  %v812_v10 = vld [vmem:[#allocation5 + $0x60] sm:$0xf]  ;;  %v804_v17 = vld [vmem:[#allocation5 + $0x50] sm:$0xf] }
  0x1b   :  { %428 = vmatpush.bf16.msrb.mxu1 %v858_v52  ;;  %v782_v48 = vld [vmem:[#allocation5 + $0x28] sm:$0xf0]  ;;  %v772_v50 = vld [vmem:[#allocation5 + $0x10] sm:$0xf]  ;;  %v863_v51 = vld [vmem:[#allocation5 + $0x14] sm:$0xf0] }
  0x1c   :  { %v862_v52 = vld [vmem:[#allocation5 + $0x14] sm:$0xf] }
  0x1d   :  { %180 = vmatpush.bf16.msra.mxu2 %v831_v11  ;;  %v825_v11 = vor.u32 %v874_v8, %v822_v9 }
  0x1e   :  { %262 = vmatpush.bf16.msra.mxu3 %v840_v18  ;;  %346 = vmatpush.bf16.msrb.mxu0 %v849_v34  ;;  %v871_v18 = vld [vmem:[#allocation5 + $0x54] sm:$0xf0] }
  0x1f   :  { %429 = vmatpush.bf16.msrb.mxu1 %v857_v53  ;;  %v773_v53 = vor.u32 %v863_v51, %v772_v50 }
  0x21   :  { %181 = vmatpush.bf16.msra.mxu2 %v830_v12  ;;  %v873_v12 = vld [vmem:[#allocation5 + $0x64] sm:$0xf0] }
  0x22   :  { %263 = vmatpush.bf16.msra.mxu3 %v839_v28  ;;  %347 = vmatpush.bf16.msrb.mxu0 %v848_v35  ;;  %v813_v15 = vor.u32 %v873_v12, %v812_v10  ;;  %v761_v12 = vld [vmem:[%s1055_s3 + $0x5] ss:$8 sm:$0x3] }
  0x23   :  { %430 = vmatpush.bf16.msrb.mxu1 %v856_v54  ;;  %v774_v54 = vld [vmem:[#allocation5 + $0x18] sm:$0xf0] }
  0x25   :  { %182 = vmatpush.bf16.msra.mxu2 %v829_v13  ;;  %v872_v13 = vld [vmem:[#allocation5 + $0x64] sm:$0xf] }
  0x26   :  { %264 = vmatpush.bf16.msra.mxu3 %v838_v29  ;;  %348 = vmatpush.bf16.msrb.mxu0 %v847_v44  ;;  %v780_v44 = vld [vmem:[#allocation5 + $0x20] sm:$0xf] }
  0x27   :  { %431 = vmatpush.bf16.msrb.mxu1 %v855_v1 }
  0x29   :  { %183 = vmatpush.bf16.msra.mxu2 %v828_v14  ;;  %v814_v14 = vld [vmem:[#allocation5 + $0x68] sm:$0xf0] }
  0x2a   :  { %265 = vmatpush.bf16.msra.mxu3 %v837_v30  ;;  %349 = vmatpush.bf16.msrb.mxu0 %v846_v45  ;;  %v817_v16 = vor.u32 %v872_v13, %v814_v14  ;;  %v865_v45 = vld [vmem:[#allocation5 + $0x24] sm:$0xf0]  ;;  %v466_v13 = vperm.slane %v761_v12, 1 }
  0x2b   :  { %432 = vmatpush.bf16.msrb.mxu1 %v854_v2 }
  0x2d   :  { %549 = vmatpush.bf16.msrb.mxu2 %v821_v7 }
  0x2e   :  { %266 = vmatpush.bf16.msra.mxu3 %v836_v31  ;;  %350 = vmatpush.bf16.msrb.mxu0 %v845_v46  ;;  %v295_v31 = vld [vmem:[%s1055_s3 + $0x3] ss:$0 sm:$0xff]  ;;  %v864_v46 = vld [vmem:[#allocation5 + $0x24] sm:$0xf] }
  0x2f   :  { %433 = vmatpush.bf16.msrb.mxu1 %v853_v3  ;;  %v785_v49 = vor.u32 %v864_v46, %v782_v48  ;;  %v378_v3 = vld [vmem:[%s1055_s3 + $0x4] ss:$0 sm:$0xff] }
  0x31   :  { %550 = vmatpush.bf16.msrb.mxu2 %v813_v15 }
  0x32   :  { %351 = vmatpush.bf16.msrb.mxu0 %v844_v47  ;;  %563 = vmatpush.bf16.msrb.mxu3 %v825_v11  ;;  %v781_v47 = vor.u32 %v865_v45, %v780_v44 }
  0x33   :  { %434 = vmatpush.bf16.msrb.mxu1 %v852_v4 }
  0x36   :  { %564 = vmatpush.bf16.msrb.mxu3 %v817_v16 }
  0x92   :  { %v89_v20 = vpop.f32.mrf.mxu0 }
  0x93   :  { %v90_v22 = vadd.f32 %v89_v20, %v60_v21  ;;  %v870_v20 = vld [vmem:[#allocation5 + $0x54] sm:$0xf] }
  0x95   :  { %v108_v25 = vmax.f32 %v90_v22, 0.0 }
  0x9a   :  { %v91_v23 = vpop.f32.mrf.mxu0 }
  0x9b   :  { %v92_v24 = vadd.f32 %v91_v23, %v60_v21  ;;  %v806_v21 = vld [vmem:[#allocation5 + $0x58] sm:$0xf0] }
  0x9c   :  { %v809_v23 = vor.u32 %v870_v20, %v806_v21 }
  0x9d   :  { %v109_v26 = vmax.f32 %v92_v24, 0.0 }
  0x9e   :  { %565 = vmatpush.bf16.msrb.mxu3 %v809_v23 }
  0x9f   :  { %v110_v27 = vpack.c.bf16 %v109_v26, %v108_v25  ;;  %v869_v25 = vld [vmem:[#allocation5 + $0x44] sm:$0xf0]  ;;  %v868_v26 = vld [vmem:[#allocation5 + $0x44] sm:$0xf] }
  0xa1   :  { %184 = vmatmul.bf16.vlgmr.msra.gmra.mxu2 %v110_v27  ;;  %v798_v27 = vld [vmem:[#allocation5 + $0x48] sm:$0xf0] }
  0xa2   :  { %v801_v29 = vor.u32 %v868_v26, %v798_v27 }
  0xa4   :  { %566 = vmatpush.bf16.msrb.mxu3 %v801_v29 }
 0x124   :  { %v185_v36 = vpop.f32.mrf.mxu2 }
 0x125   :  { %v186_v38 = vadd.f32 %v185_v36, %v127_v37 }
 0x127   :  { %v190_v41 = vmax.f32 %v186_v38, 0.0  ;;  %v788_v38 = vld [vmem:[#allocation5 + $0x30] sm:$0xf] }
 0x12c   :  { %v187_v39 = vpop.f32.mrf.mxu2 }
 0x12d   :  { %v188_v40 = vadd.f32 %v187_v39, %v127_v37  ;;  %v867_v39 = vld [vmem:[#allocation5 + $0x34] sm:$0xf0] }
 0x12f   :  { %v191_v42 = vmax.f32 %v188_v40, 0.0  ;;  %v866_v40 = vld [vmem:[#allocation5 + $0x34] sm:$0xf] }
 0x131   :  { %v192_v43 = vpack.c.bf16 %v191_v42, %v190_v41  ;;  %v789_v41 = vor.u32 %v867_v39, %v788_v38  ;;  %v790_v42 = vld [vmem:[#allocation5 + $0x38] sm:$0xf0] }
 0x133   :  { %267 = vmatmul.bf16.vlgmr.msra.gmra.mxu3 %v192_v43  ;;  %v793_v43 = vor.u32 %v866_v40, %v790_v42 }
 0x135   :  { %567 = vmatpush.bf16.msrb.mxu3 %v793_v43 }
 0x139   :  { %568 = vmatpush.bf16.msrb.mxu3 %v785_v49 }
 0x1b6   :  { %v268_v55 = vpop.f32.mrf.mxu3 }
 0x1b7   :  { %v269_v57 = vadd.f32 %v268_v55, %v210_v56  ;;  %v777_v55 = vor.u32 %v862_v52, %v774_v54 }
 0x1b9   :  { %v1031_v59 = vadd.f32 %v269_v57, %v90_v22  ;;  %v805_v22 = vor.u32 %v871_v18, %v804_v17  ;;  %569 = vmatpush.bf16.msrb.mxu3 %v777_v55  ;;  %v861_v57 = vld [vmem:[#allocation5 + $0x4] sm:$0xf0]  ;;  %v465_v18 = vperm.slane %v761_v12, 0 }
 0x1bb   :  { %v275_v62 = vmax.f32 %v1031_v59, 0.0  ;;  %551 = vmatpush.bf16.msrb.mxu2 %v805_v22 }
 0x1be   :  { %v270_v58 = vpop.f32.mrf.mxu3 }
 0x1bf   :  { %v271_v60 = vadd.f32 %v270_v58, %v210_v56  ;;  %v764_v56 = vld [vmem:[#allocation5] sm:$0xf]  ;;  %v860_v58 = vld [vmem:[#allocation5 + $0x4] sm:$0xf] }
 0x1c1   :  { %v1033_v61 = vadd.f32 %v271_v60, %v92_v24  ;;  %v796_v24 = vld [vmem:[#allocation5 + $0x40] sm:$0xf]  ;;  %v765_v60 = vor.u32 %v861_v57, %v764_v56 }
 0x1c2   :  { %v797_v28 = vor.u32 %v869_v25, %v796_v24 }
 0x1c3   :  { %v276_v63 = vmax.f32 %v1033_v61, 0.0 }
 0x1c4   :  { %552 = vmatpush.bf16.msrb.mxu2 %v797_v28 }
 0x1c5   :  { %v277_v0 = vpack.c.bf16 %v276_v63, %v275_v62  ;;  %v766_v62 = vld [vmem:[#allocation5 + $0x8] sm:$0xf0] }
 0x1c6   :  { %v769_v63 = vor.u32 %v860_v58, %v766_v62 }
 0x1c7   :  { %352 = vmatmul.bf16.vlgmr.msrb.gmra.mxu0 %v277_v0  ;;  %v103_v0 = vpop.f32.mrf.mxu1 }
 0x1c8   :  { %553 = vmatpush.bf16.msrb.mxu2 %v789_v41  ;;  %570 = vmatpush.bf16.msrb.mxu3 %v769_v63 }
 0x1cc   :  { %554 = vmatpush.bf16.msrb.mxu2 %v781_v47 }
 0x1cf   :  { %v105_v1 = vpop.f32.mrf.mxu1 }
 0x1d0   :  { %555 = vmatpush.bf16.msrb.mxu2 %v773_v53 }
 0x1d4   :  { %556 = vmatpush.bf16.msrb.mxu2 %v765_v60 }
 0x244   :  { %v353_v30 = vpop.f32.mrf.mxu0 }
 0x245   :  { %v354_v32 = vadd.f32 %v353_v30, %v295_v31 }
 0x247   :  { %v358_v35 = vmax.f32 %v354_v32, 0.0 }
 0x24c   :  { %v355_v33 = vpop.f32.mrf.mxu0 }
 0x24d   :  { %v356_v34 = vadd.f32 %v355_v33, %v295_v31 }
 0x24f   :  { %v359_v36 = vmax.f32 %v356_v34, 0.0 }
 0x251   :  { %v360_v37 = vpack.c.bf16 %v359_v36, %v358_v35 }
 0x253   :  { %435 = vmatmul.bf16.vlgmr.msrb.gmra.mxu1 %v360_v37  ;;  %v597_v37 = vlaneseq }
 0x255   :  { %v598_v41 = vand.u32 127, %v597_v37 }
 0x257   :  { %vm599_vm2 = vcmp.lt.s32.totalorder %v598_v41, 8 }
 0x2d0   :  { %v436_v2 = vpop.f32.mrf.mxu1 }
 0x2d1   :  { %v437_v4 = vadd.f32 %v436_v2, %v378_v3 }
 0x2d3   :  { %v441_v6 = vadd.f32 %v437_v4, %v1031_v59  ;;  %v61_v59 = vperm.slane %v1018_v19, 1 }
 0x2d5   :  { %v443_v9 = vmax.f32 %v441_v6, 0.0  ;;  %v104_v23 = vadd.f32 %v103_v0, %v61_v59  ;;  %v106_v32 = vadd.f32 %v105_v1, %v61_v59 }
 0x2d8   :  { %v438_v5 = vpop.f32.mrf.mxu1 }
 0x2d9   :  { %v439_v7 = vadd.f32 %v438_v5, %v378_v3 }
 0x2db   :  { %v442_v8 = vadd.f32 %v439_v7, %v1033_v61 }
 0x2dd   :  { %v444_v10 = vmax.f32 %v442_v8, 0.0 }
 0x2df   :  { %v445_v11 = vpack.c.bf16 %v444_v10, %v443_v9 }
 0x2e1   :  { %557 = vmatmul.bf16.vlgmr.msrb.gmra.mxu2 %v445_v11  ;;  %571 = vmatmul.bf16.vlgmr.msrb.gmra.mxu3 %v445_v11 }
 0x364   :  { %v572_v14 = vpop.f32.mrf.mxu3  ;;  %v558_v16 = vpop.f32.mrf.mxu2 }
 0x365   :  { %v573_v15 = vadd.f32 %v572_v14, %v466_v13  ;;  %v559_v61 = vadd.f32 %v558_v16, %v465_v18 }
 0x367   :  { %v579_v17 = vsub.f32 0.0, %v573_v15  ;;  %v577_v25 = vsub.f32 %v104_v23, %v559_v61 }
 0x369   :  { %v581_v20 = vmul.f32 1.442695, %v579_v17 }
 0x36b   :  { %885 = vpow2.f32 %v581_v20 }
 0x36c   :  { %v574_v21 = vpop.f32.mrf.mxu3  ;;  %v560_v27 = vpop.f32.mrf.mxu2 }
 0x36d   :  { %v575_v22 = vadd.f32 %v574_v21, %v466_v13  ;;  %v561_v31 = vadd.f32 %v560_v27, %v465_v18 }
 0x36f   :  { %v580_v24 = vsub.f32 0.0, %v575_v22  ;;  %v578_v34 = vsub.f32 %v106_v32, %v561_v31 }
 0x371   :  { %v886_v26 = vpop.eup %885  ;;  %v583_v28 = vmul.f32 1.442695, %v580_v24 }
 0x372   :  { %v585_v29 = vmul.f32 %v886_v26, %v577_v25 }
 0x373   :  { %887 = vpow2.f32 %v583_v28 }
 0x374   :  { %v587_v30 = vmul.f32 -0.5, %v585_v29 }
 0x376   :  { %v589_v33 = vmul.f32 %v587_v30, %v585_v29 }
 0x378   :  { %v591_v36 = vsub.f32 %v589_v33, %v573_v15 }
 0x379   :  { %v888_v35 = vpop.eup %887 }
 0x37a   :  { %v586_v19 = vmul.f32 %v888_v35, %v578_v34  ;;  %v826_v39 = vadd.f32 -0.9189385, %v591_v36 }
 0x37c   :  { %v588_v38 = vmul.f32 -0.5, %v586_v19  ;;  %v595_v44 = vmax.f32 %v826_v39, -23.02585 }
 0x37e   :  { %v590_v40 = vmul.f32 %v588_v38, %v586_v19  ;;  %v600_v46 = vsel %vm599_vm2, %v595_v44, 0.0 }
 0x380   :  { %v592_v42 = vsub.f32 %v590_v40, %v575_v22 }
 0x382   :  { %v827_v43 = vadd.f32 -0.9189385, %v592_v42 }
 0x384   :  { %v596_v45 = vmax.f32 %v827_v43, -23.02585 }
 0x386   :  { %v601_v47 = vsel %vm599_vm2, %v596_v45, 0.0 }
 0x387   :  { %v602_v48 = vadd.f32 %v601_v47, %v600_v46 }
 0x389   :  { %603 = vadd.xlane.f32.xlu0 %v602_v48 }
 0x3fc   :  { %v604_v49 = vpop.xlane.xlu0 %603 }
 0x3fd   :  { %v605_v50 = vrot.slane %v604_v49, 4 }
 0x3ff   :  { %v606_v51 = vadd.f32 %v605_v50, %v604_v49 }
 0x401   :  { %v607_v52 = vrot.slane %v606_v51, 2 }
 0x403   :  { %v608_v53 = vadd.f32 %v607_v52, %v606_v51 }
 0x405   :  { %v609_v54 = vrot.slane %v608_v53, 1 }
 0x407   :  { %v610_v55 = vadd.f32 %v609_v54, %v608_v53 }
 0x409   :  { %876 = vpush %v610_v55 }
 0x43a   :  { %s877_s23 = spop %876 }
 0x43b   :  { %613 = sst [smem:[#allocation7]] %s877_s23 }
 0x43c   :  { %622 = dma.smem_to_hbm %s961_s24, 16, %s620_s22, [#allocation4]  }
 0x43d   :  { %953 = dma.done.wait [#allocation4], 16  }
 0x43e   :  { %954 = vsyncadd [#allocation4], 4294967280 }
 0x43f   :  { %627 = sfence }
 0x440   :  { %628 = vsyncpa [#allocation3], 1 }
 0x441   :  { %629 = vsyncpa [#allocation6], 1 }
 0x442   :  { %630 = vsyncpa [#allocation4], 1 }

</bundles_post_ra>
